<compile_context>
chip_gen: v7x
topology: tpu7x:2x2x1
jax: 0.10.0
libtpu: 0.0.40
codegen_flags: <defaults>
</compile_context>

<pallas_src>
import functools

import jax
import jax.numpy as jnp
from jax.experimental import pallas as pl
from jax.experimental.pallas import tpu as pltpu


def _normalize_kernel(x_ref, o_ref, *, power):
    x = x_ref[...].astype(jnp.float32)                 # (1, C, tile_s)
    if power == 2:
        ssum = jnp.sum(x * x, axis=1, keepdims=True)   # sublane reduce -> (1,1,ts)
        norm = jnp.sqrt(ssum)
    else:
        ssum = jnp.sum(x ** power, axis=1, keepdims=True)
        norm = ssum ** (1.0 / power)
    o_ref[...] = (x / norm).astype(o_ref.dtype)


def _pick_spatial_tile(S, C, itemsize, max_block_bytes=4 << 20):
    """Largest lane-multiple tile that divides S and keeps a block <= ~4 MiB."""
    if S % 128 != 0:
        return S                                       # full-extent block is always legal
    best = 128
    t = 128
    while t <= S:
        if S % t == 0 and t * C * itemsize <= max_block_bytes:
            best = t
        t *= 2
    if S * C * itemsize <= max_block_bytes:
        best = S
    return best


def normalize_pallas(x, power=2):
    """Pallas equivalent of Normalize.forward: x / (x**power).sum(1, keepdim)**(1/power)."""
    orig_shape = x.shape
    assert x.ndim >= 2, "Normalize reduces over dim 1; need rank >= 2"
    B, C = orig_shape[0], orig_shape[1]
    S = 1
    for d in orig_shape[2:]:
        S *= d
    x3 = x.reshape(B, C, S)                            # reduction axis -> sublanes, spatial -> lanes

    tile_s = _pick_spatial_tile(S, C, x3.dtype.itemsize)
    grid = (B, S // tile_s)

    kernel = functools.partial(_normalize_kernel, power=power)
    out = pl.pallas_call(
        kernel,
        out_shape=jax.ShapeDtypeStruct((B, C, S), x3.dtype),
        grid_spec=pltpu.PrefetchScalarGridSpec(
            num_scalar_prefetch=0,
            grid=grid,
            in_specs=[pl.BlockSpec((1, C, tile_s), lambda b, s: (b, 0, s))],
            out_specs=pl.BlockSpec((1, C, tile_s), lambda b, s: (b, 0, s)),
        ),
        compiler_params=pltpu.CompilerParams(
            dimension_semantics=("parallel", "parallel")),
    )(x3)
    return out.reshape(orig_shape)


# Pure-JAX reference for correctness checks.
def _reference(x, power=2):
    norm = jnp.sum(x ** power, axis=1, keepdims=True) ** (1.0 / power)
    return x / norm


if __name__ == "__main__":
    key = jax.random.PRNGKey(0)
    k1, k2 = jax.random.split(key)

    # 4-D case: (B, C, H, W) = (2, 4, 16, 16), normalize over the channel dim.
    x4 = jax.random.normal(k1, (2, 4, 16, 16), jnp.float32)
    out4 = jax.jit(normalize_pallas)(x4)
    jax.block_until_ready(out4)
    ref4 = _reference(x4)
    assert out4.shape == x4.shape
    assert jnp.allclose(out4, ref4, rtol=1e-5, atol=1e-5), "4D mismatch vs reference"

    # 2-D case: (N, D) = (8, 32) feature vectors (the common use of Normalize).
    x2 = jax.random.normal(k2, (8, 32), jnp.float32)
    out2 = jax.jit(normalize_pallas)(x2)
    jax.block_until_ready(out2)
    ref2 = _reference(x2)
    assert jnp.allclose(out2, ref2, rtol=1e-5, atol=1e-5), "2D mismatch vs reference"

    print("KERNEL_OK")
</pallas_src>

<mosaic_0001>
module attributes {stable_mosaic.version = 11 : i64} {
  func.func @_normalize_kernel(%arg0: i32, %arg1: i32, %arg2: memref<1x4x256xf32, #tpu.memory_space<vmem>>, %arg3: memref<1x4x256xf32, #tpu.memory_space<vmem>>) attributes {dimension_semantics = [#tpu.dimension_semantics<parallel>, #tpu.dimension_semantics<parallel>], iteration_bounds = array<i64: 2, 1>, scalar_prefetch = 0 : i64, scratch_operands = 0 : i64, tpu.core_type = #tpu.core_type<tc>, window_params = [{transform_indices = @transform_0, window_bounds = array<i64: 1, 4, 256>}, {transform_indices = @transform_1, window_bounds = array<i64: 1, 4, 256>}]} {
    %c0 = arith.constant 0 : index
    %c0_0 = arith.constant 0 : index
    %c0_1 = arith.constant 0 : index
    %0 = vector.load %arg2[%c0, %c0_0, %c0_1] : memref<1x4x256xf32, #tpu.memory_space<vmem>>, vector<1x4x256xf32>
    %1 = arith.mulf %0, %0 : vector<1x4x256xf32>
    %cst = arith.constant dense<0.000000e+00> : vector<1x256xf32>
    %2 = vector.multi_reduction <add>, %1, %cst [1] : vector<1x4x256xf32> to vector<1x256xf32>
    %3 = vector.shape_cast %2 : vector<1x256xf32> to vector<1x1x256xf32>
    %4 = math.sqrt %3 : vector<1x1x256xf32>
    %5 = vector.broadcast %4 : vector<1x1x256xf32> to vector<1x4x256xf32>
    %6 = arith.divf %0, %5 : vector<1x4x256xf32>
    %c0_2 = arith.constant 0 : index
    %c0_3 = arith.constant 0 : index
    %c0_4 = arith.constant 0 : index
    %7 = vector.load %arg3[%c0_2, %c0_3, %c0_4] : memref<1x4x256xf32, #tpu.memory_space<vmem>>, vector<1x4x256xf32>
    tpu.vector_store %arg3[%c0_2, %c0_3, %c0_4], %6 {strides = array<i32>} : memref<1x4x256xf32, #tpu.memory_space<vmem>>, vector<1x4x256xf32>,
    return
  }
  func.func @transform_0(%arg0: i32, %arg1: i32) -> (i32, i32, i32) {
    %c0_i32 = arith.constant 0 : i32
    %c0_i32_0 = arith.constant 0 : i32
    return %arg0, %c0_i32, %arg1 : i32, i32, i32
  }
  func.func @transform_1(%arg0: i32, %arg1: i32) -> (i32, i32, i32) {
    %c0_i32 = arith.constant 0 : i32
    %c0_i32_0 = arith.constant 0 : i32
    return %arg0, %c0_i32, %arg1 : i32, i32, i32
  }
}

</mosaic_0001>

<bundles_post_ra>
// kernel: normalize_pallas.1
= control target key start
LH: loop header
LB: loop body
LE: loop exit
PB: predicated region body
PF: predicated region fallthrough
CT: control target
= control target key end

     0   :  { %s361_s6 = smov 0   ;;  %s363_s7 = smov 0   ;;  %s401_s0 = inlined_call_operand.vmem [shape: f32[2,4,256], index: 0, kind: input, shape index: {}]   ;;  %s402_s1 = inlined_call_operand.vmem [shape: f32[2,4,256], index: 1, kind: output, shape index: {}]  }
   0x1   :  { %s365_s8 = smov 0  }
   0x2 LB: > { %s23_s9 = sadd.s32 1, %s345_s7  ;;  %p288_p0 = scmp.ge.s32.totalorder %s349_s8, 1  ;;  %s349_s8 = sphi %s365_s8, %s11_s8   ;;  %s345_s7 = sphi %s363_s7, %s404_s7   ;;  %s341_s6 = sphi %s361_s6, %s403_s6  }
   0x3   : > { %p25_p1 = scmp.ge.s32.totalorder %s23_s9, 2  ;;  %p108_p2 = scmp.lt.s32.totalorder %s349_s8, 3 }
   0x5   : > { %s406_s9 = smov (%p25_p1, %s23_s9), 0  ;;  %p109_p3 = pnand %p288_p0, %p108_p2 }
   0x6   : > { %p137_p4 = scmp.lt.s32.totalorder (!%p109_p3), %s341_s6, 1  ;;  %vm161_vm0 = vcmask (!%p109_p3), 1043456  }
   0x7   : > { %112 = sbr.rel (%p109_p3) target bundleno = 66 (0x42), region = 24 }
   0xe   : > { %s408_s6 = smov (!%p137_p4, %s341_s6), 1 }
   0xf   : > { %s295_s10 = sshll.u32 %s408_s6, 3 }
  0x10   : > { %s144_s13 = scalar_lea.vmem %s401_s0, %s295_s10  ;;  %s154_s16 = scalar_lea.vmem %s402_s1, %s295_s10 }
  0x11   : > { %v156_v0 = vld [vmem:[%s144_s13] sm:$0xff] }
  0x12   : > { %v157_v1 = vmul.f32 %v156_v0, %v156_v0 }
  0x14   : > { %v159_v2 = vcombine.high %v157_v1, %v157_v1  ;;  %v162_v3 = vsel %vm161_vm0, %v157_v1, 0.0 }
  0x15   : > { %v163_v4 = vrot.slane %v162_v3, 4 }
  0x16   : > { %v169_v5 = vsel %vm161_vm0, %v159_v2, 0.0 }
  0x17   : > { %v164_v6 = vadd.f32 %v163_v4, %v162_v3  ;;  %v170_v7 = vrot.slane %v169_v5, 4 }
  0x19   : > { %v165_v8 = vrot.slane %v164_v6, 2  ;;  %v171_v9 = vadd.f32 %v170_v7, %v169_v5 }
  0x1b   : > { %v166_v10 = vadd.f32 %v165_v8, %v164_v6  ;;  %v172_v11 = vrot.slane %v171_v9, 2 }
  0x1d   : > { %v167_v12 = vrot.slane %v166_v10, 1  ;;  %v173_v13 = vadd.f32 %v172_v11, %v171_v9 }
  0x1f   : > { %v168_v14 = vadd.f32 %v167_v12, %v166_v10  ;;  %v174_v15 = vrot.slane %v173_v13, 1 }
  0x21   : > { %v175_v16 = vadd.f32 %v174_v15, %v173_v13  ;;  %321 = vrsqrt.f32 %v168_v14  ;;  %vm178_vm1 = vcmp.eq.f32.partialorder %v168_v14, inf  ;;  %v181_v18 = vand.u32 2147483648, %v168_v14 }
  0x22   : > { %vm180_vm2 = vcmp.eq.f32.partialorder %v168_v14, 0.0 }
  0x23   : > { %323 = vrsqrt.f32 %v175_v16  ;;  %vm185_vm3 = vcmp.eq.f32.partialorder %v175_v16, inf  ;;  %v188_v21 = vand.u32 2147483648, %v175_v16  ;;  %vm187_vm4 = vcmp.eq.f32.partialorder %v175_v16, 0.0 }
  0x2b   : > { %v322_v17 = vpop.eup %321 }
  0x2c   : > { %v177_v19 = vmul.f32 %v322_v17, %v168_v14 }
  0x2d   : > { %v324_v20 = vpop.eup %323 }
  0x2e   : > { %v179_v22 = vsel %vm178_vm1, %v168_v14, %v177_v19  ;;  %v184_v23 = vmul.f32 %v324_v20, %v175_v16 }
  0x2f   : > { %v182_v24 = vsel %vm180_vm2, %v181_v18, %v179_v22 }
  0x30   : > { %v186_v25 = vsel %vm185_vm3, %v175_v16, %v184_v23 }
  0x31   : > { %v189_v26 = vsel %vm187_vm4, %v188_v21, %v186_v25 }
  0x32   : > { %v192_v27 = vcombine.low %v182_v24, %v189_v26 }
  0x34   : > { %325 = vrcp.f32 %v192_v27 }
  0x3e   : > { %v326_v28 = vpop.eup %325 }
  0x3f   : > { %v195_v29 = vmul.f32 %v326_v28, %v156_v0 }
  0x41   : > { %196 = vst [vmem:[%s154_s16] sm:$0xff] %v195_v29 }
  0x42 PF: > { %s11_s8 = sadd.s32 1, %s349_s8   ;;  %s403_s6 = smov %s345_s7 }
  0x43   : > { %p8_p5 = scmp.ge.s32.totalorder %s11_s8, 4   ;;  %s404_s7 = smov %s406_s9 }
  0x45   :  { %10 = sbr.rel (!%p8_p5) target bundleno = 2 (0x2), region = 54 }

</bundles_post_ra>
